<compile_context>
chip_gen: v7x
topology: tpu7x:2x2x1
jax: 0.10.0
libtpu: 0.0.40
codegen_flags: <defaults>
</compile_context>

<pallas_src>
import math
import functools

import jax
import jax.numpy as jnp
import numpy as np
from jax.experimental import pallas as pl
from jax.experimental.pallas import tpu as pltpu


NEGATIVE_SLOPE = 0.01   # torch.nn.LeakyReLU default
MIN_TILE_B = 128        # keeps the batch-tile sublane dim a multiple of 8
MAX_TILE_B = 2048       # double-buffered footprint still far below VMEM limits
GRID_TARGET = 4         # aim for >=2 (ideally >=4) grid steps for v7x's 2 TCs


def _cdiv(a, b):
    return -(-a // b)


def _round_up(n, m):
    return ((n + m - 1) // m) * m


def _choose_tile_b(batch):
    """Pick a batch tile: as large as possible while keeping >=2 grid steps."""
    t = _round_up(max(_cdiv(batch, GRID_TARGET), 1), MIN_TILE_B)
    return max(MIN_TILE_B, min(MAX_TILE_B, t))


def _make_mlp_kernel(num_layers: int):
    """Fused MLP kernel. Ref order: (x, w0, b0, w1, b1, ..., out)."""

    def kernel(*refs):
        x_ref = refs[0]
        out_ref = refs[-1]
        param_refs = refs[1:-1]

        h = x_ref[...]  # f32 [tile_b, d_in]
        for i in range(num_layers):
            w = param_refs[2 * i][...]        # f32 [D_in, D_out]
            b = param_refs[2 * i + 1][...]    # f32 [1, D_out]
            h = jnp.dot(h, w, preferred_element_type=jnp.float32) + b
            if i + 1 != num_layers:
                # LeakyReLU (negative_slope = 0.01) in f32 on the VPU
                # (v5e has no bf16 VALU, so f32 works on every generation).
                h = jnp.where(h >= 0.0, h, NEGATIVE_SLOPE * h)
            else:
                # Exact sigmoid: exp on the EUP + exact divide; stays in [0, 1].
                h = 1.0 / (1.0 + jnp.exp(-h))
        out_ref[...] = h.astype(out_ref.dtype)

    return kernel


@jax.jit
def discriminator_forward(x, params):
    """Run the fused Discriminator forward pass.

    x:      [B, input_dim] float32
    params: list of (W, b) with W: [D_in, D_out] (transposed vs PyTorch's
            [out, in]) and b: [1, D_out], all float32.
    returns [B, layers[-1]] float32 in [0, 1]
    """
    num_layers = len(params)
    B, d_in = x.shape
    out_dim = params[-1][0].shape[1]

    tile_b = _choose_tile_b(B)
    b_pad = _round_up(B, tile_b)

    x_in = x.astype(jnp.float32)
    if b_pad != B:
        # Only the trailing partial tile is padded (rows of zeros); for batches
        # that already divide tile_b this is a no-op (no wrapper copy at all).
        x_in = jnp.pad(x_in, ((0, b_pad - B), (0, 0)))

    flat_params = []
    for w, b in params:
        flat_params += [w.astype(jnp.float32), b.astype(jnp.float32)]

    kernel = _make_mlp_kernel(num_layers)
    grid = (b_pad // tile_b,)

    # Activations tile over the batch; weights/biases are full-array blocks
    # with constant index_maps, so they remain VMEM-resident across tiles.
    in_specs = [pl.BlockSpec((tile_b, d_in), lambda i: (i, 0))]
    for w, b in params:
        in_specs.append(pl.BlockSpec(w.shape, lambda i: (0, 0)))
        in_specs.append(pl.BlockSpec(b.shape, lambda i: (0, 0)))

    flops = 2 * b_pad * sum(int(w.shape[0]) * int(w.shape[1]) for w, _ in params)
    bytes_accessed = (
        b_pad * d_in * 4
        + sum(int(w.size) * 4 + int(b.size) * 4 for w, b in params)
        + b_pad * out_dim * 4
    )
    cost = pl.CostEstimate(
        flops=flops,
        transcendentals=b_pad * out_dim,
        bytes_accessed=bytes_accessed,
    )

    out = pl.pallas_call(
        kernel,
        out_shape=jax.ShapeDtypeStruct((b_pad, out_dim), jnp.float32),
        grid_spec=pltpu.PrefetchScalarGridSpec(
            num_scalar_prefetch=0,
            grid=grid,
            in_specs=in_specs,
            out_specs=pl.BlockSpec((tile_b, out_dim), lambda i: (i, 0)),
        ),
        compiler_params=pltpu.CompilerParams(
            dimension_semantics=("parallel",),
        ),
        cost_estimate=cost,
    )(x_in, *flat_params)

    if b_pad != B:
        out = out[:B]
    return out


def init_discriminator_params(key, input_dim, layers):
    """Deterministic init mirroring nn.Linear's default U(-1/sqrt(fan_in), ...)."""
    params = []
    last = input_dim
    for width in layers:
        key, kw, kb = jax.random.split(key, 3)
        bound = 1.0 / math.sqrt(last)
        # Stored as [D_in, D_out] (transpose of PyTorch's [out, in]).
        w = jax.random.uniform(
            kw, (last, width), jnp.float32, minval=-bound, maxval=bound
        )
        b = jax.random.uniform(
            kb, (1, width), jnp.float32, minval=-bound, maxval=bound
        )
        params.append((w, b))
        last = width
    return params


def discriminator_reference(x, params):
    """Pure-JAX f32 reference of the PyTorch forward pass (for validation)."""
    h = x
    num_layers = len(params)
    for i, (w, b) in enumerate(params):
        h = h @ w + b
        if i + 1 != num_layers:
            h = jnp.where(h >= 0.0, h, NEGATIVE_SLOPE * h)
        else:
            h = jax.nn.sigmoid(h)
    return h


if __name__ == "__main__":
    key = jax.random.PRNGKey(0)

    # Shapes implied by the module: flat feature vectors per sample.
    # batch=256 exercises a 2-step batch-parallel grid (tile_b=128).
    batch = 256
    input_dim = 32
    layers = [64, 32, 1]  # hidden widths + output width (Sigmoid output)

    key, kx, kp = jax.random.split(key, 3)
    x = jax.random.normal(kx, (batch, input_dim), dtype=jnp.float32)
    params = init_discriminator_params(kp, input_dim, layers)

    out = jax.block_until_ready(discriminator_forward(x, params))
    ref = discriminator_reference(x, params)

    assert out.shape == (batch, layers[-1])
    # f32 end-to-end; tolerance only covers MXU f32 rounding across 3 layers.
    np.testing.assert_allclose(np.asarray(out), np.asarray(ref), rtol=1e-2, atol=1e-2)
    # Exact sigmoid => result is mathematically inside [0, 1].
    assert np.all(np.asarray(out) >= 0.0) and np.all(np.asarray(out) <= 1.0)

    print("KERNEL_OK")
</pallas_src>

<mosaic_0001>
module attributes {stable_mosaic.version = 11 : i64} {
  func.func @kernel(%arg0: i32, %arg1: memref<128x32xf32, #tpu.memory_space<vmem>>, %arg2: memref<32x64xf32, #tpu.memory_space<vmem>>, %arg3: memref<1x64xf32, #tpu.memory_space<vmem>>, %arg4: memref<64x32xf32, #tpu.memory_space<vmem>>, %arg5: memref<1x32xf32, #tpu.memory_space<vmem>>, %arg6: memref<32x1xf32, #tpu.memory_space<vmem>>, %arg7: memref<1x1xf32, #tpu.memory_space<vmem>>, %arg8: memref<128x1xf32, #tpu.memory_space<vmem>>) attributes {dimension_semantics = [#tpu.dimension_semantics<parallel>], iteration_bounds = array<i64: 2>, scalar_prefetch = 0 : i64, scratch_operands = 0 : i64, tpu.core_type = #tpu.core_type<tc>, window_params = [{transform_indices = @transform_0, window_bounds = array<i64: 128, 32>}, {pipeline_mode = #tpu.pipeline_mode<synchronous>, transform_indices = @transform_1, window_bounds = array<i64: 32, 64>}, {pipeline_mode = #tpu.pipeline_mode<synchronous>, transform_indices = @transform_2, window_bounds = array<i64: 1, 64>}, {pipeline_mode = #tpu.pipeline_mode<synchronous>, transform_indices = @transform_3, window_bounds = array<i64: 64, 32>}, {pipeline_mode = #tpu.pipeline_mode<synchronous>, transform_indices = @transform_4, window_bounds = array<i64: 1, 32>}, {pipeline_mode = #tpu.pipeline_mode<synchronous>, transform_indices = @transform_5, window_bounds = array<i64: 32, 1>}, {pipeline_mode = #tpu.pipeline_mode<synchronous>, transform_indices = @transform_6, window_bounds = array<i64: 1, 1>}, {transform_indices = @transform_7, window_bounds = array<i64: 128, 1>}]} {
    %c0 = arith.constant 0 : index
    %c0_0 = arith.constant 0 : index
    %0 = vector.load %arg1[%c0, %c0_0] : memref<128x32xf32, #tpu.memory_space<vmem>>, vector<128x32xf32>
    %c0_1 = arith.constant 0 : index
    %c0_2 = arith.constant 0 : index
    %1 = vector.load %arg2[%c0_1, %c0_2] : memref<32x64xf32, #tpu.memory_space<vmem>>, vector<32x64xf32>
    %c0_3 = arith.constant 0 : index
    %c0_4 = arith.constant 0 : index
    %2 = vector.load %arg3[%c0_3, %c0_4] : memref<1x64xf32, #tpu.memory_space<vmem>>, vector<1x64xf32>
    %cst = arith.constant dense<0.000000e+00> : vector<128x64xf32>
    %3 = tpu.matmul %0, %1, %cst {dimension_numbers = #tpu.dot_dimension_numbers<[1], [0], [0], [1], [0, 0, 1, 1], [], []>} : vector<128x32xf32>, vector<32x64xf32>, vector<128x64xf32> -> vector<128x64xf32>
    %4 = vector.broadcast %2 : vector<1x64xf32> to vector<128x64xf32>
    %5 = arith.addf %3, %4 : vector<128x64xf32>
    %cst_5 = arith.constant 0.000000e+00 : f32
    %6 = vector.broadcast %cst_5 : f32 to vector<128x64xf32>
    %7 = arith.cmpf oge, %5, %6 : vector<128x64xf32>
    %cst_6 = arith.constant 0.00999999977 : f32
    %8 = vector.broadcast %cst_6 : f32 to vector<128x64xf32>
    %9 = arith.mulf %8, %5 : vector<128x64xf32>
    %10 = arith.select %7, %5, %9 : vector<128x64xi1>, vector<128x64xf32>
    %c0_7 = arith.constant 0 : index
    %c0_8 = arith.constant 0 : index
    %11 = vector.load %arg4[%c0_7, %c0_8] : memref<64x32xf32, #tpu.memory_space<vmem>>, vector<64x32xf32>
    %c0_9 = arith.constant 0 : index
    %c0_10 = arith.constant 0 : index
    %12 = vector.load %arg5[%c0_9, %c0_10] : memref<1x32xf32, #tpu.memory_space<vmem>>, vector<1x32xf32>
    %cst_11 = arith.constant dense<0.000000e+00> : vector<128x32xf32>
    %13 = tpu.matmul %10, %11, %cst_11 {dimension_numbers = #tpu.dot_dimension_numbers<[1], [0], [0], [1], [0, 0, 1, 1], [], []>} : vector<128x64xf32>, vector<64x32xf32>, vector<128x32xf32> -> vector<128x32xf32>
    %14 = vector.broadcast %12 : vector<1x32xf32> to vector<128x32xf32>
    %15 = arith.addf %13, %14 : vector<128x32xf32>
    %cst_12 = arith.constant 0.000000e+00 : f32
    %16 = vector.broadcast %cst_12 : f32 to vector<128x32xf32>
    %17 = arith.cmpf oge, %15, %16 : vector<128x32xf32>
    %cst_13 = arith.constant 0.00999999977 : f32
    %18 = vector.broadcast %cst_13 : f32 to vector<128x32xf32>
    %19 = arith.mulf %18, %15 : vector<128x32xf32>
    %20 = arith.select %17, %15, %19 : vector<128x32xi1>, vector<128x32xf32>
    %c0_14 = arith.constant 0 : index
    %c0_15 = arith.constant 0 : index
    %21 = vector.load %arg6[%c0_14, %c0_15] : memref<32x1xf32, #tpu.memory_space<vmem>>, vector<32x1xf32>
    %c0_16 = arith.constant 0 : index
    %c0_17 = arith.constant 0 : index
    %22 = vector.load %arg7[%c0_16, %c0_17] : memref<1x1xf32, #tpu.memory_space<vmem>>, vector<1x1xf32>
    %cst_18 = arith.constant dense<0.000000e+00> : vector<128x1xf32>
    %23 = tpu.matmul %20, %21, %cst_18 {dimension_numbers = #tpu.dot_dimension_numbers<[1], [0], [0], [1], [0, 0, 1, 1], [], []>} : vector<128x32xf32>, vector<32x1xf32>, vector<128x1xf32> -> vector<128x1xf32>
    %24 = vector.broadcast %22 : vector<1x1xf32> to vector<128x1xf32>
    %25 = arith.addf %23, %24 : vector<128x1xf32>
    %cst_19 = arith.constant 0.000000e+00 : f32
    %26 = vector.broadcast %cst_19 : f32 to vector<128x1xf32>
    %27 = arith.subf %26, %25 : vector<128x1xf32>
    %28 = math.exp %27 : vector<128x1xf32>
    %cst_20 = arith.constant 1.000000e+00 : f32
    %29 = vector.broadcast %cst_20 : f32 to vector<128x1xf32>
    %30 = arith.addf %29, %28 : vector<128x1xf32>
    %cst_21 = arith.constant 1.000000e+00 : f32
    %31 = vector.broadcast %cst_21 : f32 to vector<128x1xf32>
    %32 = arith.divf %31, %30 : vector<128x1xf32>
    %c0_22 = arith.constant 0 : index
    %c0_23 = arith.constant 0 : index
    %33 = vector.load %arg8[%c0_22, %c0_23] : memref<128x1xf32, #tpu.memory_space<vmem>>, vector<128x1xf32>
    tpu.vector_store %arg8[%c0_22, %c0_23], %32 {strides = array<i32>} : memref<128x1xf32, #tpu.memory_space<vmem>>, vector<128x1xf32>,
    return
  }
  func.func @transform_0(%arg0: i32) -> (i32, i32) {
    %c0_i32 = arith.constant 0 : i32
    %c0_i32_0 = arith.constant 0 : i32
    return %arg0, %c0_i32 : i32, i32
  }
  func.func @transform_1(%arg0: i32) -> (i32, i32) {
    %c0_i32 = arith.constant 0 : i32
    %c0_i32_0 = arith.constant 0 : i32
    %c0_i32_1 = arith.constant 0 : i32
    return %c0_i32, %c0_i32_0 : i32, i32
  }
  func.func @transform_2(%arg0: i32) -> (i32, i32) {
    %c0_i32 = arith.constant 0 : i32
    %c0_i32_0 = arith.constant 0 : i32
    %c0_i32_1 = arith.constant 0 : i32
    return %c0_i32, %c0_i32_0 : i32, i32
  }
  func.func @transform_3(%arg0: i32) -> (i32, i32) {
    %c0_i32 = arith.constant 0 : i32
    %c0_i32_0 = arith.constant 0 : i32
    %c0_i32_1 = arith.constant 0 : i32
    return %c0_i32, %c0_i32_0 : i32, i32
  }
  func.func @transform_4(%arg0: i32) -> (i32, i32) {
    %c0_i32 = arith.constant 0 : i32
    %c0_i32_0 = arith.constant 0 : i32
    %c0_i32_1 = arith.constant 0 : i32
    return %c0_i32, %c0_i32_0 : i32, i32
  }
  func.func @transform_5(%arg0: i32) -> (i32, i32) {
    %c0_i32 = arith.constant 0 : i32
    %c0_i32_0 = arith.constant 0 : i32
    %c0_i32_1 = arith.constant 0 : i32
    return %c0_i32, %c0_i32_0 : i32, i32
  }
  func.func @transform_6(%arg0: i32) -> (i32, i32) {
    %c0_i32 = arith.constant 0 : i32
    %c0_i32_0 = arith.constant 0 : i32
    %c0_i32_1 = arith.constant 0 : i32
    return %c0_i32, %c0_i32_0 : i32, i32
  }
  func.func @transform_7(%arg0: i32) -> (i32, i32) {
    %c0_i32 = arith.constant 0 : i32
    %c0_i32_0 = arith.constant 0 : i32
    return %arg0, %c0_i32 : i32, i32
  }
}

</mosaic_0001>

<bundles_post_ra>
// kernel: discriminator_forward.1
= control target key start
LH: loop header
LB: loop body
LE: loop exit
PB: predicated region body
PF: predicated region fallthrough
CT: control target
= control target key end

     0   :  { %s1572_s26 = smov 0   ;;  %s1805_s0 = inlined_call_operand.vmem [shape: f32[256,32], index: 0, kind: input, shape index: {}]   ;;  %s1806_s1 = inlined_call_operand.vmem [shape: f32[32,64], index: 1, kind: input, shape index: {}]   ;;  %s1807_s2 = inlined_call_operand.vmem [shape: f32[1,64], index: 2, kind: input, shape index: {}]   ;;  %s1808_s3 = inlined_call_operand.vmem [shape: f32[64,32], index: 3, kind: input, shape index: {}]   ;;  %s1809_s4 = inlined_call_operand.vmem [shape: f32[1,32], index: 4, kind: input, shape index: {}]   ;;  %s1810_s5 = inlined_call_operand.vmem [shape: f32[32,1], index: 5, kind: input, shape index: {}]   ;;  %s1811_s6 = inlined_call_operand.<no memory space> [shape: f32[1,1], index: 6, kind: input, shape index: {}]   ;;  %s1812_s7 = inlined_call_operand.vmem [shape: f32[256,1], index: 7, kind: output, shape index: {}]  }
   0x1   :  { %v12_v0 = vstv %s1811_s6 }
   0x2   :  { %13 = vst [vmem:[#allocation2] sm:$0x1] %v12_v0 }
   0x3 LB: > { %s1183_s27 = sadd.s32 4294967295, %s1527_s26   ;;  %p1187_p0 = scmp.ge.s32.totalorder %s1527_s26, 1  ;;  %s1527_s26 = sphi %s1572_s26, %s19_s26  }
   0x4   : > { %p240_p1 = scmp.lt.s32.totalorder %s1527_s26, 3 }
   0x6   : > { %p241_p2 = pnand %p1187_p0, %p240_p1 }
   0x7   : > { %v300_v1 = vld [vmem:[%s1806_s1] sm:$0xff] (!%p241_p2)  ;;  %v301_v2 = vld [vmem:[%s1806_s1 + $0x8] sm:$0xff] (!%p241_p2)  ;;  %v302_v3 = vld [vmem:[%s1806_s1 + $0x10] sm:$0xff] (!%p241_p2)  ;;  %s1188_s10 = sshll.u32 (!%p241_p2), %s1183_s27, 4  ;;  %vm311_vm0 = vcmask (!%p241_p2), 261120   ;;  %vm568_vm3 = vcmask (!%p241_p2), 523264  }
   0x8   : > { %244 = sbr.rel (%p241_p2) target bundleno = 732 (0x2dc), region = 48  ;;  %v1413_v4 = vpack.c.bf16 (!%p241_p2), %v301_v2, %v300_v1  ;;  %v303_v5 = vld [vmem:[%s1806_s1 + $0x18] sm:$0xff] (!%p241_p2)  ;;  %p273_p3 = scmp.lt.s32.totalorder (!%p241_p2), %s1188_s10, 31  ;;  %v553_v7 = vld [vmem:[%s1808_s3] sm:$0xff] (!%p241_p2)  ;;  %v554_v8 = vld [vmem:[%s1808_s3 + $0x8] sm:$0xff] (!%p241_p2) }
   0x9   : > { %v1417_v6 = vpack.c.bf16 (!%p241_p2), %v303_v5, %v302_v3  ;;  %v1421_v9 = vpack.c.bf16 (!%p241_p2), %v554_v8, %v553_v7  ;;  %v555_v11 = vld [vmem:[%s1808_s3 + $0x10] sm:$0xff] (!%p241_p2)  ;;  %v556_v12 = vld [vmem:[%s1808_s3 + $0x18] sm:$0xff] (!%p241_p2)  ;;  %v557_v19 = vld [vmem:[%s1808_s3 + $0x20] sm:$0xff] (!%p241_p2) }
   0xa   : > { %1414 = vmatprep.subr.bf16.mxu0 (!%p241_p2), %v1413_v4  ;;  %1445 = vmatprep.subr.bf16.mxu1 (!%p241_p2), %v1413_v4  ;;  %v1425_v18 = vpack.c.bf16 (!%p241_p2), %v556_v12, %v555_v11  ;;  %v558_v20 = vld [vmem:[%s1808_s3 + $0x28] sm:$0xff] (!%p241_p2)  ;;  %v559_v32 = vld [vmem:[%s1808_s3 + $0x30] sm:$0xff] (!%p241_p2)  ;;  %v560_v33 = vld [vmem:[%s1808_s3 + $0x38] sm:$0xff] (!%p241_p2) }
   0xb   : > { %1416 = vmatpush3.bf16.msra.mxu0 (!%p241_p2), %v1413_v4  ;;  %1447 = vmatpush3.bf16.msra.mxu1 (!%p241_p2), %v1413_v4  ;;  %v1429_v25 = vpack.c.bf16 (!%p241_p2), %v558_v20, %v557_v19  ;;  %v1433_v34 = vpack.c.bf16 (!%p241_p2), %v560_v33, %v559_v32  ;;  %v810_v35 = vld [vmem:[%s1810_s5] sm:$0xff] (!%p241_p2)  ;;  %v811_v36 = vld [vmem:[%s1810_s5 + $0x8] sm:$0xff] (!%p241_p2)  ;;  %v812_v37 = vld [vmem:[%s1810_s5 + $0x10] sm:$0xff] (!%p241_p2) }
   0xc   : > { %1418 = vmatprep.subr.bf16.mxu0 (!%p241_p2), %v1417_v6  ;;  %1446 = vmatprep.subr.bf16.mxu1 (!%p241_p2), %v1417_v6  ;;  %v1437_v38 = vpack.c.bf16 (!%p241_p2), %v811_v36, %v810_v35  ;;  %v813_v39 = vld [vmem:[%s1810_s5 + $0x18] sm:$0xff] (!%p241_p2)  ;;  %v1673_v41 = vld [vmem:[%s1807_s2] ss:$0 sm:$0xff] (!%p241_p2) }
   0xd   : > { %v1441_v40 = vpack.c.bf16 (!%p241_p2), %v813_v39, %v812_v37 }
   0xf   : > { %s1814_s10 = smov (!%p273_p3, %s1188_s10), 31  ;;  %1420 = vmatpush3.bf16.msra.mxu0 %v1417_v6  ;;  %1448 = vmatpush3.bf16.msra.mxu1 %v1417_v6 }
  0x10   : > { %s1189_s17 = sshll.u32 %s1814_s10, 3  ;;  %1422 = vmatprep.subr.bf16.mxu1 %v1421_v9  ;;  %1438 = vmatprep.subr.bf16.mxu0 %v1437_v38 }
  0x11   : > { %s1606_s20 = scalar_lea.vmem %s1805_s0, %s1189_s17  ;;  %s1766_s27 = scalar_lea.vmem %s1812_s7, %s1189_s17 }
  0x12   : > { %v284_v10 = vld [vmem:[%s1606_s20] sm:$0xff]  ;;  %v285_v13 = vld [vmem:[%s1606_s20 + $0x8] sm:$0xff]  ;;  %v286_v14 = vld [vmem:[%s1606_s20 + $0x10] sm:$0xff] }
  0x13   : > { %1317 = vmatprep.mubr.msk.f32.mxu0 %vm311_vm0, %v284_v10  ;;  %v292_v15 = vld [vmem:[%s1606_s20 + $0x40] sm:$0xff]  ;;  %v293_v16 = vld [vmem:[%s1606_s20 + $0x48] sm:$0xff]  ;;  %v294_v17 = vld [vmem:[%s1606_s20 + $0x50] sm:$0xff] }
  0x14   : > { %1329 = vmatprep.mubr.msk.f32.mxu1 %vm311_vm0, %v292_v15  ;;  %1318 = vmatmul.mubr.msk.f32.vlgmr.msra.gmra.mrb[0].mxu0 %vm311_vm0, %v285_v13  ;;  %v287_v21 = vld [vmem:[%s1606_s20 + $0x18] sm:$0xff]  ;;  %v288_v22 = vld [vmem:[%s1606_s20 + $0x20] sm:$0xff]  ;;  %v289_v26 = vld [vmem:[%s1606_s20 + $0x28] sm:$0xff] }
  0x15   : > { %1320 = vmatprep.mubr.msk.f32.mxu0 %vm311_vm0, %v286_v14  ;;  %1330 = vmatmul.mubr.msk.f32.vlgmr.msra.gmra.mrb[0].mxu1 %vm311_vm0, %v293_v16  ;;  %v295_v23 = vld [vmem:[%s1606_s20 + $0x58] sm:$0xff]  ;;  %v296_v24 = vld [vmem:[%s1606_s20 + $0x60] sm:$0xff]  ;;  %v290_v27 = vld [vmem:[%s1606_s20 + $0x30] sm:$0xff] }
  0x16   : > { %1332 = vmatprep.mubr.msk.f32.mxu1 %vm311_vm0, %v294_v17  ;;  %1424 = vmatpush3.bf16.msra.mxu1 %v1421_v9  ;;  %v297_v28 = vld [vmem:[%s1606_s20 + $0x68] sm:$0xff]  ;;  %v298_v29 = vld [vmem:[%s1606_s20 + $0x70] sm:$0xff]  ;;  %v291_v30 = vld [vmem:[%s1606_s20 + $0x38] sm:$0xff] }
  0x17   : > { %1426 = vmatprep.subr.bf16.mxu1 %v1425_v18  ;;  %v299_v31 = vld [vmem:[%s1606_s20 + $0x78] sm:$0xff]  ;;  %1440 = vmatpush3.bf16.msra.mxu0 %v1437_v38 }
  0x18   : > { %1321 = vmatmul.mubr.msk.f32.gmra.mrb[2].mxu0 %vm311_vm0, %v287_v21  ;;  %1442 = vmatprep.subr.bf16.mxu0 %v1441_v40 }
  0x19   : > { %1323 = vmatprep.mubr.msk.f32.mxu0 %vm311_vm0, %v288_v22  ;;  %1333 = vmatmul.mubr.msk.f32.gmra.mrb[2].mxu1 %vm311_vm0, %v295_v23 }
  0x1a   : > { %1335 = vmatprep.mubr.msk.f32.mxu1 %vm311_vm0, %v296_v24  ;;  %1428 = vmatpush3.bf16.msra.mxu1 %v1425_v18 }
  0x1b   : > { %1430 = vmatprep.subr.bf16.mxu1 %v1429_v25  ;;  %1444 = vmatpush3.bf16.msra.mxu0 %v1441_v40 }
  0x1c   : > { %1324 = vmatmul.mubr.msk.f32.gmra.mrb[4].mxu0 %vm311_vm0, %v289_v26 }
  0x1d   : > { %1326 = vmatprep.mubr.msk.f32.mxu0 %vm311_vm0, %v290_v27  ;;  %1336 = vmatmul.mubr.msk.f32.gmra.mrb[4].mxu1 %vm311_vm0, %v297_v28 }
  0x1e   : > { %1338 = vmatprep.mubr.msk.f32.mxu1 %vm311_vm0, %v298_v29  ;;  %1432 = vmatpush3.bf16.msra.mxu1 %v1429_v25 }
  0x1f   : > { %1434 = vmatprep.subr.bf16.mxu1 %v1433_v34 }
  0x20   : > { %1327 = vmatmul.mubr.msk.f32.gmra.mrb[6].mxu0 %vm311_vm0, %v291_v30 }
  0x21   : > { %1339 = vmatmul.mubr.msk.f32.gmra.mrb[6].mxu1 %vm311_vm0, %v299_v31 }
  0x22   : > { %1436 = vmatpush3.bf16.msra.mxu1 %v1433_v34 }
  0xe7   : > { %v1319_v42 = vpop.f32.mrb[0].mxu0 }
  0xe8   : > { %v432_v43 = vadd.f32 %v1319_v42, %v1673_v41  ;;  %v426_v44 = vpop.f32.mrb[1].mxu0  ;;  %v1331_v45 = vpop.f32.mrb[0].mxu1 }
  0xe9   : > { %v427_v46 = vadd.f32 %v1673_v41, %v426_v44  ;;  %v466_v47 = vpop.f32.mrb[1].mxu1  ;;  %v472_v17 = vadd.f32 %v1331_v45, %v1673_v41 }
  0xea   : > { %v522_v48 = vmul.f32 0.01, %v432_v43  ;;  %vm506_vm1 = vcmp.ge.f32.partialorder %v432_v43, 0.0  ;;  %v467_v2 = vadd.f32 %v1673_v41, %v466_v47 }
  0xeb   : > { %vm505_vm2 = vcmp.ge.f32.partialorder %v427_v46, 0.0  ;;  %v521_v49 = vmul.f32 0.01, %v427_v46  ;;  %v1322_v50 = vpop.f32.mrb[2].mxu0  ;;  %v530_v24 = vmul.f32 0.01, %v472_v17 }
  0xec   : > { %v442_v51 = vadd.f32 %v1322_v50, %v1673_v41  ;;  %v436_v52 = vpop.f32.mrb[3].mxu0  ;;  %v1334_v53 = vpop.f32.mrb[2].mxu1  ;;  %v538_v57 = vsel %vm506_vm1, %v432_v43, %v522_v48  ;;  %v529_v12 = vmul.f32 0.01, %v467_v2  ;;  %vm513_vm8 = vcmp.ge.f32.partialorder %v467_v2, 0.0 }
  0xed   : > { %v437_v54 = vadd.f32 %v1673_v41, %v436_v52  ;;  %v537_v55 = vsel %vm505_vm2, %v427_v46, %v521_v49  ;;  %v476_v56 = vpop.f32.mrb[3].mxu1  ;;  %v482_v25 = vadd.f32 %v1334_v53, %v1673_v41  ;;  %vm514_vm12 = vcmp.ge.f32.partialorder %v472_v17, 0.0 }
  0xee   : > { %v524_v58 = vmul.f32 0.01, %v442_v51  ;;  %1357 = vmatprep.mubr.msk.f32.mxu1 %vm568_vm3, %v537_v55  ;;  %vm508_vm4 = vcmp.ge.f32.partialorder %v442_v51, 0.0  ;;  %v477_v14 = vadd.f32 %v1673_v41, %v476_v56  ;;  %v545_v22 = vsel %vm513_vm8, %v467_v2, %v529_v12 }
  0xef   : > { %vm507_vm5 = vcmp.ge.f32.partialorder %v437_v54, 0.0  ;;  %v523_v59 = vmul.f32 0.01, %v437_v54  ;;  %v1325_v60 = vpop.f32.mrb[4].mxu0  ;;  %1358 = vmatmul.mubr.msk.f32.vlgmr.msra.gmra.mrb[8].mxu1 %vm568_vm3, %v538_v57  ;;  %v532_v30 = vmul.f32 0.01, %v482_v25  ;;  %v546_v32 = vsel %vm514_vm12, %v472_v17, %v530_v24 }
  0xf0   : > { %v452_v61 = vadd.f32 %v1325_v60, %v1673_v41  ;;  %v446_v62 = vpop.f32.mrb[5].mxu0  ;;  %v1337_v63 = vpop.f32.mrb[4].mxu1  ;;  %v540_v5 = vsel %vm508_vm4, %v442_v51, %v524_v58  ;;  %v531_v20 = vmul.f32 0.01, %v477_v14  ;;  %vm515_vm11 = vcmp.ge.f32.partialorder %v477_v14, 0.0 }
  0xf1   : > { %v447_v0 = vadd.f32 %v1673_v41, %v446_v62  ;;  %v539_v1 = vsel %vm507_vm5, %v437_v54, %v523_v59  ;;  %v486_v3 = vpop.f32.mrb[5].mxu1  ;;  %v492_v31 = vadd.f32 %v1337_v63, %v1673_v41  ;;  %vm516_vm14 = vcmp.ge.f32.partialorder %v482_v25, 0.0 }
  0xf2   : > { %v526_v4 = vmul.f32 0.01, %v452_v61  ;;  %1360 = vmatprep.mubr.msk.f32.mxu1 %vm568_vm3, %v539_v1  ;;  %vm510_vm6 = vcmp.ge.f32.partialorder %v452_v61, 0.0  ;;  %v487_v23 = vadd.f32 %v1673_v41, %v486_v3  ;;  %v547_v28 = vsel %vm515_vm11, %v477_v14, %v531_v20 }
  0xf3   : > { %vm509_vm7 = vcmp.ge.f32.partialorder %v447_v0, 0.0  ;;  %v525_v6 = vmul.f32 0.01, %v447_v0  ;;  %v1328_v7 = vpop.f32.mrb[6].mxu0  ;;  %1361 = vmatmul.mubr.msk.f32.gmra.mrb[10].mxu1 %vm568_vm3, %v540_v5  ;;  %v534_v35 = vmul.f32 0.01, %v492_v31  ;;  %v548_v37 = vsel %vm516_vm14, %v482_v25, %v532_v30 }
  0xf4   : > { %v462_v8 = vadd.f32 %v1328_v7, %v1673_v41  ;;  %v456_v9 = vpop.f32.mrb[7].mxu0  ;;  %v1340_v10 = vpop.f32.mrb[6].mxu1  ;;  %v542_v18 = vsel %vm510_vm6, %v452_v61, %v526_v4  ;;  %v533_v27 = vmul.f32 0.01, %v487_v23  ;;  %vm517_vm13 = vcmp.ge.f32.partialorder %v487_v23, 0.0 }
  0xf5   : > { %v457_v11 = vadd.f32 %v1673_v41, %v456_v9  ;;  %v541_v13 = vsel %vm509_vm7, %v447_v0, %v525_v6  ;;  %v496_v15 = vpop.f32.mrb[7].mxu1  ;;  %v502_v36 = vadd.f32 %v1340_v10, %v1673_v41  ;;  %vm518_vm1 = vcmp.ge.f32.partialorder %v492_v31, 0.0 }
  0xf6   : > { %v528_v16 = vmul.f32 0.01, %v462_v8  ;;  %1363 = vmatprep.mubr.msk.f32.mxu1 %vm568_vm3, %v541_v13  ;;  %vm512_vm9 = vcmp.ge.f32.partialorder %v462_v8, 0.0  ;;  %v497_v29 = vadd.f32 %v1673_v41, %v496_v15  ;;  %v549_v34 = vsel %vm517_vm13, %v487_v23, %v533_v27  ;;  %v1711_v41 = vld [vmem:[%s1809_s4] ss:$0 sm:$0xff] }
  0xf7   : > { %vm511_vm10 = vcmp.ge.f32.partialorder %v457_v11, 0.0  ;;  %v527_v19 = vmul.f32 0.01, %v457_v11  ;;  %1364 = vmatmul.mubr.msk.f32.gmra.mrb[12].mxu1 %vm568_vm3, %v542_v18  ;;  %v536_v39 = vmul.f32 0.01, %v502_v36  ;;  %v550_v40 = vsel %vm518_vm1, %v492_v31, %v534_v35 }
  0xf8   : > { %v544_v26 = vsel %vm512_vm9, %v462_v8, %v528_v16  ;;  %v535_v33 = vmul.f32 0.01, %v497_v29  ;;  %vm519_vm15 = vcmp.ge.f32.partialorder %v497_v29, 0.0  ;;  %vm520_vm2 = vcmp.ge.f32.partialorder %v502_v36, 0.0 }
  0xf9   : > { %v543_v21 = vsel %vm511_vm10, %v457_v11, %v527_v19  ;;  %v552_v42 = vsel %vm520_vm2, %v502_v36, %v536_v39 }
  0xfa   : > { %1366 = vmatprep.mubr.msk.f32.mxu1 %vm568_vm3, %v543_v21  ;;  %v551_v38 = vsel %vm519_vm15, %v497_v29, %v535_v33 }
  0xfb   : > { %1367 = vmatmul.mubr.msk.f32.gmra.mrb[14].mxu1 %vm568_vm3, %v544_v26 }
  0xfc   : > { %1369 = vmatprep.mubr.msk.f32.mxu1 %vm568_vm3, %v545_v22 }
  0xff   : > { %1370 = vmatmul.mubr.msk.f32.gmra.mrb[16].mxu1 %vm568_vm3, %v546_v32 }
 0x100   : > { %1372 = vmatprep.mubr.msk.f32.mxu1 %vm568_vm3, %v547_v28 }
 0x103   : > { %1373 = vmatmul.mubr.msk.f32.gmra.mrb[18].mxu1 %vm568_vm3, %v548_v37 }
 0x104   : > { %1375 = vmatprep.mubr.msk.f32.mxu1 %vm568_vm3, %v549_v34 }
 0x107   : > { %1376 = vmatmul.mubr.msk.f32.gmra.mrb[20].mxu1 %vm568_vm3, %v550_v40 }
 0x108   : > { %1378 = vmatprep.mubr.msk.f32.mxu1 %vm568_vm3, %v551_v38 }
 0x10b   : > { %1379 = vmatmul.mubr.msk.f32.gmra.mrb[22].mxu1 %vm568_vm3, %v552_v42 }
 0x1c2   : > { %v1359_v43 = vpop.f32.mrb[8].mxu1 }
 0x1c3   : > { %v689_v44 = vadd.f32 %v1359_v43, %v1711_v41  ;;  %v683_v45 = vpop.f32.mrb[9].mxu1 }
 0x1c4   : > { %v684_v46 = vadd.f32 %v1711_v41, %v683_v45 }
 0x1c5   : > { %v779_v47 = vmul.f32 0.01, %v689_v44  ;;  %vm763_vm4 = vcmp.ge.f32.partialorder %v689_v44, 0.0 }
 0x1c6   : > { %vm762_vm5 = vcmp.ge.f32.partialorder %v684_v46, 0.0  ;;  %v778_v48 = vmul.f32 0.01, %v684_v46  ;;  %v1362_v49 = vpop.f32.mrb[10].mxu1 }
 0x1c7   : > { %v699_v50 = vadd.f32 %v1362_v49, %v1711_v41  ;;  %v693_v51 = vpop.f32.mrb[11].mxu1  ;;  %v795_v54 = vsel %vm763_vm4, %v689_v44, %v779_v47  ;;  %v1745_v44 = vld [vmem:[#allocation2] ss:$0 sm:$0xff] }
 0x1c8   : > { %v694_v52 = vadd.f32 %v1711_v41, %v693_v51  ;;  %v794_v53 = vsel %vm762_vm5, %v684_v46, %v778_v48 }
 0x1c9   : > { %v781_v55 = vmul.f32 0.01, %v699_v50  ;;  %1389 = vmatprep.mubr.msk.f32.mxu0 %vm311_vm0, %v794_v53  ;;  %vm765_vm3 = vcmp.ge.f32.partialorder %v699_v50, 0.0 }
 0x1ca   : > { %vm764_vm6 = vcmp.ge.f32.partialorder %v694_v52, 0.0  ;;  %v780_v56 = vmul.f32 0.01, %v694_v52  ;;  %v1365_v57 = vpop.f32.mrb[12].mxu1  ;;  %1390 = vmatmul.mubr.msk.f32.vlgmr.msra.gmra.mrb[8].mxu0 %vm311_vm0, %v795_v54 }
 0x1cb   : > { %v709_v58 = vadd.f32 %v1365_v57, %v1711_v41  ;;  %v703_v59 = vpop.f32.mrb[13].mxu1  ;;  %v797_v63 = vsel %vm765_vm3, %v699_v50, %v781_v55 }
 0x1cc   : > { %v704_v60 = vadd.f32 %v1711_v41, %v703_v59  ;;  %v796_v61 = vsel %vm764_vm6, %v694_v52, %v780_v56 }
 0x1cd   : > { %v783_v62 = vmul.f32 0.01, %v709_v58  ;;  %1392 = vmatprep.mubr.msk.f32.mxu0 %vm311_vm0, %v796_v61  ;;  %vm767_vm7 = vcmp.ge.f32.partialorder %v709_v58, 0.0 }
 0x1ce   : > { %vm766_vm8 = vcmp.ge.f32.partialorder %v704_v60, 0.0  ;;  %v782_v0 = vmul.f32 0.01, %v704_v60  ;;  %v1368_v1 = vpop.f32.mrb[14].mxu1  ;;  %1393 = vmatmul.mubr.msk.f32.gmra.mrb[10].mxu0 %vm311_vm0, %v797_v63 }
 0x1cf   : > { %v719_v2 = vadd.f32 %v1368_v1, %v1711_v41  ;;  %v713_v3 = vpop.f32.mrb[15].mxu1  ;;  %v799_v7 = vsel %vm767_vm7, %v709_v58, %v783_v62 }
 0x1d0   : > { %v714_v4 = vadd.f32 %v1711_v41, %v713_v3  ;;  %v798_v5 = vsel %vm766_vm8, %v704_v60, %v782_v0 }
 0x1d1   : > { %v785_v6 = vmul.f32 0.01, %v719_v2  ;;  %1395 = vmatprep.mubr.msk.f32.mxu0 %vm311_vm0, %v798_v5  ;;  %vm769_vm9 = vcmp.ge.f32.partialorder %v719_v2, 0.0 }
 0x1d2   : > { %vm768_vm10 = vcmp.ge.f32.partialorder %v714_v4, 0.0  ;;  %v784_v8 = vmul.f32 0.01, %v714_v4  ;;  %v1371_v9 = vpop.f32.mrb[16].mxu1  ;;  %1396 = vmatmul.mubr.msk.f32.gmra.mrb[12].mxu0 %vm311_vm0, %v799_v7 }
 0x1d3   : > { %v729_v10 = vadd.f32 %v1371_v9, %v1711_v41  ;;  %v723_v11 = vpop.f32.mrb[17].mxu1  ;;  %v801_v15 = vsel %vm769_vm9, %v719_v2, %v785_v6 }
 0x1d4   : > { %v724_v12 = vadd.f32 %v1711_v41, %v723_v11  ;;  %v800_v13 = vsel %vm768_vm10, %v714_v4, %v784_v8 }
 0x1d5   : > { %v787_v14 = vmul.f32 0.01, %v729_v10  ;;  %1398 = vmatprep.mubr.msk.f32.mxu0 %vm311_vm0, %v800_v13  ;;  %vm771_vm11 = vcmp.ge.f32.partialorder %v729_v10, 0.0 }
 0x1d6   : > { %vm770_vm12 = vcmp.ge.f32.partialorder %v724_v12, 0.0  ;;  %v786_v16 = vmul.f32 0.01, %v724_v12  ;;  %v1374_v17 = vpop.f32.mrb[18].mxu1  ;;  %1399 = vmatmul.mubr.msk.f32.gmra.mrb[14].mxu0 %vm311_vm0, %v801_v15 }
 0x1d7   : > { %v739_v18 = vadd.f32 %v1374_v17, %v1711_v41  ;;  %v733_v19 = vpop.f32.mrb[19].mxu1  ;;  %v803_v23 = vsel %vm771_vm11, %v729_v10, %v787_v14 }
 0x1d8   : > { %v734_v20 = vadd.f32 %v1711_v41, %v733_v19  ;;  %v802_v21 = vsel %vm770_vm12, %v724_v12, %v786_v16 }
 0x1d9   : > { %v789_v22 = vmul.f32 0.01, %v739_v18  ;;  %1401 = vmatprep.mubr.msk.f32.mxu0 %vm311_vm0, %v802_v21  ;;  %vm773_vm13 = vcmp.ge.f32.partialorder %v739_v18, 0.0 }
 0x1da   : > { %vm772_vm14 = vcmp.ge.f32.partialorder %v734_v20, 0.0  ;;  %v788_v24 = vmul.f32 0.01, %v734_v20  ;;  %v1377_v25 = vpop.f32.mrb[20].mxu1  ;;  %1402 = vmatmul.mubr.msk.f32.gmra.mrb[16].mxu0 %vm311_vm0, %v803_v23 }
 0x1db   : > { %v749_v26 = vadd.f32 %v1377_v25, %v1711_v41  ;;  %v743_v27 = vpop.f32.mrb[21].mxu1  ;;  %v805_v31 = vsel %vm773_vm13, %v739_v18, %v789_v22 }
 0x1dc   : > { %v744_v28 = vadd.f32 %v1711_v41, %v743_v27  ;;  %v804_v29 = vsel %vm772_vm14, %v734_v20, %v788_v24 }
 0x1dd   : > { %v791_v30 = vmul.f32 0.01, %v749_v26  ;;  %1404 = vmatprep.mubr.msk.f32.mxu0 %vm311_vm0, %v804_v29  ;;  %vm775_vm15 = vcmp.ge.f32.partialorder %v749_v26, 0.0 }
 0x1de   : > { %vm774_vm1 = vcmp.ge.f32.partialorder %v744_v28, 0.0  ;;  %v790_v32 = vmul.f32 0.01, %v744_v28  ;;  %v1380_v33 = vpop.f32.mrb[22].mxu1  ;;  %1405 = vmatmul.mubr.msk.f32.gmra.mrb[18].mxu0 %vm311_vm0, %v805_v31 }
 0x1df   : > { %v759_v34 = vadd.f32 %v1380_v33, %v1711_v41  ;;  %v753_v35 = vpop.f32.mrb[23].mxu1  ;;  %v807_v39 = vsel %vm775_vm15, %v749_v26, %v791_v30 }
 0x1e0   : > { %v754_v36 = vadd.f32 %v1711_v41, %v753_v35  ;;  %v806_v37 = vsel %vm774_vm1, %v744_v28, %v790_v32 }
 0x1e1   : > { %v793_v38 = vmul.f32 0.01, %v759_v34  ;;  %1407 = vmatprep.mubr.msk.f32.mxu0 %vm311_vm0, %v806_v37  ;;  %vm777_vm2 = vcmp.ge.f32.partialorder %v759_v34, 0.0 }
 0x1e2   : > { %vm776_vm4 = vcmp.ge.f32.partialorder %v754_v36, 0.0  ;;  %v792_v40 = vmul.f32 0.01, %v754_v36  ;;  %1408 = vmatmul.mubr.msk.f32.gmra.mrb[20].mxu0 %vm311_vm0, %v807_v39 }
 0x1e3   : > { %v809_v43 = vsel %vm777_vm2, %v759_v34, %v793_v38 }
 0x1e4   : > { %v808_v42 = vsel %vm776_vm4, %v754_v36, %v792_v40 }
 0x1e5   : > { %1410 = vmatprep.mubr.msk.f32.mxu0 %vm311_vm0, %v808_v42 }
 0x1e6   : > { %1411 = vmatmul.mubr.msk.f32.gmra.mrb[22].mxu0 %vm311_vm0, %v809_v43  ;;  %vm1110_vm0 = vcmask 7168  }
 0x29d   : > { %v1391_v45 = vpop.f32.mrb[8].mxu0 }
 0x29e   : > { %v941_v41 = vadd.f32 %v1391_v45, %v1745_v44  ;;  %v935_v46 = vpop.f32.mrb[9].mxu0 }
 0x29f   : > { %v936_v47 = vadd.f32 %v1745_v44, %v935_v46 }
 0x2a0   : > { %v1015_v48 = vsub.f32 0.0, %v941_v41 }
 0x2a1   : > { %v1014_v49 = vsub.f32 0.0, %v936_v47  ;;  %v1394_v50 = vpop.f32.mrb[10].mxu0 }
 0x2a2   : > { %v1032_v51 = vmul.f32 1.442695, %v1015_v48  ;;  %v951_v52 = vadd.f32 %v1394_v50, %v1745_v44  ;;  %v945_v53 = vpop.f32.mrb[11].mxu0 }
 0x2a3   : > { %v1030_v54 = vmul.f32 1.442695, %v1014_v49  ;;  %v946_v55 = vadd.f32 %v1745_v44, %v945_v53 }
 0x2a4   : > { %1457 = vpow2.f32 %v1032_v51  ;;  %v1017_v56 = vsub.f32 0.0, %v951_v52 }
 0x2a5   : > { %1459 = vpow2.f32 %v1030_v54  ;;  %v1016_v57 = vsub.f32 0.0, %v946_v55  ;;  %v1397_v58 = vpop.f32.mrb[12].mxu0 }
 0x2a6   : > { %v1036_v59 = vmul.f32 1.442695, %v1017_v56  ;;  %v961_v60 = vadd.f32 %v1397_v58, %v1745_v44  ;;  %v955_v61 = vpop.f32.mrb[13].mxu0 }
 0x2a7   : > { %v1034_v62 = vmul.f32 1.442695, %v1016_v57  ;;  %v956_v63 = vadd.f32 %v1745_v44, %v955_v61 }
 0x2a8   : > { %1461 = vpow2.f32 %v1036_v59  ;;  %v1019_v0 = vsub.f32 0.0, %v961_v60 }
 0x2a9   : > { %1463 = vpow2.f32 %v1034_v62  ;;  %v1018_v1 = vsub.f32 0.0, %v956_v63  ;;  %v1400_v2 = vpop.f32.mrb[14].mxu0 }
 0x2aa   : > { %v1040_v3 = vmul.f32 1.442695, %v1019_v0  ;;  %v971_v4 = vadd.f32 %v1400_v2, %v1745_v44  ;;  %v965_v5 = vpop.f32.mrb[15].mxu0 }
 0x2ab   : > { %v1038_v6 = vmul.f32 1.442695, %v1018_v1  ;;  %v966_v7 = vadd.f32 %v1745_v44, %v965_v5 }
 0x2ac   : > { %1465 = vpow2.f32 %v1040_v3  ;;  %v1021_v8 = vsub.f32 0.0, %v971_v4 }
 0x2ad   : > { %1467 = vpow2.f32 %v1038_v6  ;;  %v1020_v9 = vsub.f32 0.0, %v966_v7  ;;  %v1403_v10 = vpop.f32.mrb[16].mxu0 }
 0x2ae   : > { %v1458_v11 = vpop.eup %1457  ;;  %v1044_v12 = vmul.f32 1.442695, %v1021_v8  ;;  %v981_v13 = vadd.f32 %v1403_v10, %v1745_v44  ;;  %v975_v14 = vpop.f32.mrb[17].mxu0 }
 0x2af   : > { %v1460_v15 = vpop.eup %1459  ;;  %v1063_v16 = vadd.f32 1.0, %v1458_v11  ;;  %v1042_v17 = vmul.f32 1.442695, %v1020_v9  ;;  %v976_v18 = vadd.f32 %v1745_v44, %v975_v14 }
 0x2b0   : > { %v1062_v19 = vadd.f32 1.0, %v1460_v15  ;;  %1469 = vpow2.f32 %v1044_v12  ;;  %v1023_v20 = vsub.f32 0.0, %v981_v13 }
 0x2b1   : > { %1471 = vrcp.f32 %v1063_v16  ;;  %v1022_v21 = vsub.f32 0.0, %v976_v18  ;;  %v1406_v22 = vpop.f32.mrb[18].mxu0 }
 0x2b2   : > { %v1462_v23 = vpop.eup %1461  ;;  %1473 = vrcp.f32 %v1062_v19  ;;  %v1048_v24 = vmul.f32 1.442695, %v1023_v20  ;;  %v991_v25 = vadd.f32 %v1406_v22, %v1745_v44  ;;  %v985_v26 = vpop.f32.mrb[19].mxu0 }
 0x2b3   : > { %v1464_v27 = vpop.eup %1463  ;;  %v1065_v28 = vadd.f32 1.0, %v1462_v23  ;;  %1475 = vpow2.f32 %v1042_v17  ;;  %v1046_v29 = vmul.f32 1.442695, %v1022_v21  ;;  %v986_v30 = vadd.f32 %v1745_v44, %v985_v26 }
 0x2b4   : > { %v1064_v31 = vadd.f32 1.0, %v1464_v27  ;;  %1477 = vpow2.f32 %v1048_v24  ;;  %v1025_v32 = vsub.f32 0.0, %v991_v25 }
 0x2b5   : > { %1479 = vrcp.f32 %v1065_v28  ;;  %v1024_v33 = vsub.f32 0.0, %v986_v30  ;;  %v1409_v34 = vpop.f32.mrb[20].mxu0 }
 0x2b6   : > { %v1466_v35 = vpop.eup %1465  ;;  %1481 = vrcp.f32 %v1064_v31  ;;  %v1052_v36 = vmul.f32 1.442695, %v1025_v32  ;;  %v1001_v37 = vadd.f32 %v1409_v34, %v1745_v44  ;;  %v995_v38 = vpop.f32.mrb[21].mxu0 }
 0x2b7   : > { %v1468_v39 = vpop.eup %1467  ;;  %v1067_v40 = vadd.f32 1.0, %v1466_v35  ;;  %1483 = vpow2.f32 %v1046_v29  ;;  %v1050_v42 = vmul.f32 1.442695, %v1024_v33  ;;  %v996_v43 = vadd.f32 %v1745_v44, %v995_v38 }
 0x2b8   : > { %v1066_v45 = vadd.f32 1.0, %v1468_v39  ;;  %1485 = vpow2.f32 %v1052_v36  ;;  %v1027_v41 = vsub.f32 0.0, %v1001_v37 }
 0x2b9   : > { %1487 = vrcp.f32 %v1067_v40  ;;  %v1026_v46 = vsub.f32 0.0, %v996_v43  ;;  %v1412_v47 = vpop.f32.mrb[22].mxu0 }
 0x2ba   : > { %v1470_v48 = vpop.eup %1469  ;;  %1489 = vrcp.f32 %v1066_v45  ;;  %v1056_v49 = vmul.f32 1.442695, %v1027_v41  ;;  %v1011_v50 = vadd.f32 %v1412_v47, %v1745_v44  ;;  %v1005_v51 = vpop.f32.mrb[23].mxu0 }
 0x2bb   : > { %v1472_v52 = vpop.eup %1471  ;;  %v1069_v53 = vadd.f32 1.0, %v1470_v48  ;;  %1491 = vpow2.f32 %v1050_v42  ;;  %v1054_v54 = vmul.f32 1.442695, %v1026_v46  ;;  %v1006_v55 = vadd.f32 %v1745_v44, %v1005_v51 }
 0x2bc   : > { %v1474_v56 = vpop.eup %1473  ;;  %1112 = vst.msk [vmem:[%s1766_s27 + $0x8] sm:$0xff] %vm1110_vm0, %v1472_v52  ;;  %1493 = vpow2.f32 %v1056_v49  ;;  %v1029_v57 = vsub.f32 0.0, %v1011_v50 }
 0x2bd   : > { %v1476_v58 = vpop.eup %1475  ;;  %1111 = vst.msk [vmem:[%s1766_s27] sm:$0xff] %vm1110_vm0, %v1474_v56  ;;  %1495 = vrcp.f32 %v1069_v53  ;;  %v1028_v59 = vsub.f32 0.0, %v1006_v55 }
 0x2be   : > { %v1478_v60 = vpop.eup %1477  ;;  %v1068_v61 = vadd.f32 1.0, %v1476_v58  ;;  %1497 = vpow2.f32 %v1054_v54  ;;  %v1060_v62 = vmul.f32 1.442695, %v1029_v57 }
 0x2bf   : > { %v1480_v63 = vpop.eup %1479  ;;  %v1071_v0 = vadd.f32 1.0, %v1478_v60  ;;  %v1058_v44 = vmul.f32 1.442695, %v1028_v59 }
 0x2c0   : > { %v1482_v1 = vpop.eup %1481  ;;  %1114 = vst.msk [vmem:[%s1766_s27 + $0x18] sm:$0xff] %vm1110_vm0, %v1480_v63  ;;  %1499 = vrcp.f32 %v1068_v61 }
 0x2c1   : > { %v1484_v2 = vpop.eup %1483  ;;  %1113 = vst.msk [vmem:[%s1766_s27 + $0x10] sm:$0xff] %vm1110_vm0, %v1482_v1  ;;  %1501 = vrcp.f32 %v1071_v0 }
 0x2c2   : > { %v1486_v3 = vpop.eup %1485  ;;  %v1070_v4 = vadd.f32 1.0, %v1484_v2  ;;  %1503 = vpow2.f32 %v1060_v62 }
 0x2c3   : > { %v1488_v5 = vpop.eup %1487  ;;  %v1073_v6 = vadd.f32 1.0, %v1486_v3  ;;  %1505 = vpow2.f32 %v1058_v44 }
 0x2c4   : > { %v1490_v7 = vpop.eup %1489  ;;  %1116 = vst.msk [vmem:[%s1766_s27 + $0x28] sm:$0xff] %vm1110_vm0, %v1488_v5  ;;  %1507 = vrcp.f32 %v1070_v4 }
 0x2c5   : > { %v1492_v8 = vpop.eup %1491  ;;  %1115 = vst.msk [vmem:[%s1766_s27 + $0x20] sm:$0xff] %vm1110_vm0, %v1490_v7  ;;  %1509 = vrcp.f32 %v1073_v6 }
 0x2c6   : > { %v1494_v9 = vpop.eup %1493  ;;  %v1072_v10 = vadd.f32 1.0, %v1492_v8 }
 0x2c7   : > { %v1496_v11 = vpop.eup %1495  ;;  %v1075_v12 = vadd.f32 1.0, %v1494_v9 }
 0x2c8   : > { %v1498_v13 = vpop.eup %1497  ;;  %1118 = vst.msk [vmem:[%s1766_s27 + $0x38] sm:$0xff] %vm1110_vm0, %v1496_v11  ;;  %1511 = vrcp.f32 %v1072_v10 }
 0x2c9   : > { %1513 = vrcp.f32 %v1075_v12  ;;  %v1074_v14 = vadd.f32 1.0, %v1498_v13 }
 0x2ca   : > { %v1500_v15 = vpop.eup %1499 }
 0x2cb   : > { %v1502_v16 = vpop.eup %1501  ;;  %1117 = vst.msk [vmem:[%s1766_s27 + $0x30] sm:$0xff] %vm1110_vm0, %v1500_v15  ;;  %1515 = vrcp.f32 %v1074_v14 }
 0x2cc   : > { %v1504_v17 = vpop.eup %1503  ;;  %1120 = vst.msk [vmem:[%s1766_s27 + $0x48] sm:$0xff] %vm1110_vm0, %v1502_v16 }
 0x2cd   : > { %v1506_v18 = vpop.eup %1505  ;;  %v1077_v19 = vadd.f32 1.0, %v1504_v17 }
 0x2ce   : > { %v1508_v20 = vpop.eup %1507  ;;  %v1076_v21 = vadd.f32 1.0, %v1506_v18 }
 0x2cf   : > { %v1510_v22 = vpop.eup %1509  ;;  %1119 = vst.msk [vmem:[%s1766_s27 + $0x40] sm:$0xff] %vm1110_vm0, %v1508_v20  ;;  %1517 = vrcp.f32 %v1077_v19 }
 0x2d0   : > { %1122 = vst.msk [vmem:[%s1766_s27 + $0x58] sm:$0xff] %vm1110_vm0, %v1510_v22  ;;  %1519 = vrcp.f32 %v1076_v21 }
 0x2d2   : > { %v1512_v23 = vpop.eup %1511 }
 0x2d3   : > { %v1514_v24 = vpop.eup %1513  ;;  %1121 = vst.msk [vmem:[%s1766_s27 + $0x50] sm:$0xff] %vm1110_vm0, %v1512_v23 }
 0x2d4   : > { %1124 = vst.msk [vmem:[%s1766_s27 + $0x68] sm:$0xff] %vm1110_vm0, %v1514_v24 }
 0x2d5   : > { %v1516_v25 = vpop.eup %1515 }
 0x2d6   : > { %1123 = vst.msk [vmem:[%s1766_s27 + $0x60] sm:$0xff] %vm1110_vm0, %v1516_v25 }
 0x2d9   : > { %v1518_v26 = vpop.eup %1517 }
 0x2da   : > { %v1520_v27 = vpop.eup %1519  ;;  %1126 = vst.msk [vmem:[%s1766_s27 + $0x78] sm:$0xff] %vm1110_vm0, %v1518_v26 }
 0x2db   : > { %1125 = vst.msk [vmem:[%s1766_s27 + $0x70] sm:$0xff] %vm1110_vm0, %v1520_v27 }
 0x2dc PF: > { %s19_s26 = sadd.s32 1, %s1527_s26  }
 0x2dd   : > { %p16_p4 = scmp.ge.s32.totalorder %s19_s26, 4  }
 0x2df   :  { %18 = sbr.rel (!%p16_p4) target bundleno = 3 (0x3), region = 78 }

</bundles_post_ra>
